<compile_context>
chip_gen: v5e
topology: v5e:2x2
jax: 0.10.0
libtpu: 0.0.40
codegen_flags: <defaults>
</compile_context>

<pallas_src>
import jax
import jax.numpy as jnp
from jax.experimental import pallas as pl
from jax.experimental.pallas import tpu as pltpu

SUBLANE = 8


def _round_up(x, m):
    return (x + m - 1) // m * m


def _mlp_kernel(x_ref, w1_ref, b1_ref, w2_ref, b2_ref, w3_ref, b3_ref, o_ref):
    # One batch tile per grid step.  Weights/biases use a constant index_map so
    # they stay VMEM-resident while the batch stream is software-pipelined.
    dot_dtype = w1_ref.dtype                       # bf16 (default) or f32
    x = x_ref[...].astype(dot_dtype)               # in-kernel cast: VPU op hidden under DMA

    h = jnp.dot(x, w1_ref[...], preferred_element_type=jnp.float32) + b1_ref[...]
    h = jnp.maximum(h, 0.0)

    h = jnp.dot(h.astype(dot_dtype), w2_ref[...],
                preferred_element_type=jnp.float32) + b2_ref[...]
    h = jnp.maximum(h, 0.0)

    h = jnp.dot(h.astype(dot_dtype), w3_ref[...],
                preferred_element_type=jnp.float32) + b3_ref[...]
    o_ref[...] = h.astype(o_ref.dtype)             # un-padded (TB, E) store


def prepare_params(params, *, use_bf16=True):
    """One-time parameter prep (hoisted out of the per-call forward).

    params: dict w1,b1,w2,b2,w3,b3 with weights stored (in, out) (== W.T of
    PyTorch's nn.Linear) and biases (1, out) or (out,).
    Weights are cast to bf16 by default (MXU-native on v5e/v6e/v7x); biases stay f32.
    """
    w_dtype = jnp.bfloat16 if use_bf16 else jnp.float32
    prep = {}
    for i in (1, 2, 3):
        prep[f"w{i}"] = jnp.asarray(params[f"w{i}"], w_dtype)
        prep[f"b{i}"] = jnp.asarray(params[f"b{i}"], jnp.float32).reshape(1, -1)
    return prep


def _xla_forward(x, prep):
    """Fused-XLA fallback for tiny batches (three small dots, no kernel launch)."""
    f32 = jnp.float32
    h = jnp.maximum(x @ prep["w1"].astype(f32) + prep["b1"], 0.0)
    h = jnp.maximum(h @ prep["w2"].astype(f32) + prep["b2"], 0.0)
    return h @ prep["w3"].astype(f32) + prep["b3"]


def memory_embedding_forward(x, prep, *, block_batch=2048, min_pallas_batch=512):
    """Forward pass of the 3-layer MLP.

    x:    (B, input_dim) float32
    prep: output of prepare_params().
    block_batch: batch tile (sweep 2048-8192 on v6e; keep <=4096 on v5e unless
                 vmem_limit_bytes is raised; re-derive for v7x's 64 MiB VMEM).
    """
    B, input_dim = x.shape
    E = prep["w3"].shape[1]

    # Tiny batches: pallas_call launch overhead dwarfs the few-KFLOP compute.
    if B < min_pallas_batch:
        return _xla_forward(x, prep)

    w1, b1 = prep["w1"], prep["b1"]
    w2, b2 = prep["w2"], prep["b2"]
    w3, b3 = prep["w3"], prep["b3"]

    # Batch tile: multiple of the 8-row sublane, clamped to the (rounded) batch.
    TB = min(_round_up(block_batch, SUBLANE), _round_up(B, SUBLANE))
    # Ragged last tile (B % TB != 0) is handled by Pallas via masked stores — no
    # wrapper-side jnp.pad pass over x in HBM.
    grid = (pl.cdiv(B, TB),)

    flops = 2 * B * (input_dim * E + 2 * E * E)
    bytes_accessed = (
        x.size * x.dtype.itemsize
        + sum(a.size * a.dtype.itemsize for a in (w1, b1, w2, b2, w3, b3))
        + B * E * 4
    )

    resident = lambda i: (0, 0)        # same block every step -> stays in VMEM

    out = pl.pallas_call(
        _mlp_kernel,
        out_shape=jax.ShapeDtypeStruct((B, E), jnp.float32),
        grid=grid,
        in_specs=[
            pl.BlockSpec((TB, input_dim), lambda i: (i, 0)),   # batch-tiled input
            pl.BlockSpec(w1.shape, resident),                  # w1 (in, E)
            pl.BlockSpec(b1.shape, resident),                  # b1 (1, E)
            pl.BlockSpec(w2.shape, resident),                  # w2 (E, E)
            pl.BlockSpec(b2.shape, resident),                  # b2 (1, E)
            pl.BlockSpec(w3.shape, resident),                  # w3 (E, E)
            pl.BlockSpec(b3.shape, resident),                  # b3 (1, E)
        ],
        out_specs=pl.BlockSpec((TB, E), lambda i: (i, 0)),     # un-padded output
        compiler_params=pltpu.CompilerParams(
            dimension_semantics=("parallel",)),                # v7x: shard batch on 2 TCs
        cost_estimate=pl.CostEstimate(flops=flops, transcendentals=0,
                                      bytes_accessed=bytes_accessed),
    )(x, w1, b1, w2, b2, w3, b3)

    return out


def init_params(key, input_dim, embedding_dim=64):
    """Deterministic init mimicking nn.Linear (uniform(-1/sqrt(fan_in), +1/sqrt(fan_in)))."""
    keys = jax.random.split(key, 6)
    dims = [(input_dim, embedding_dim), (embedding_dim, embedding_dim),
            (embedding_dim, embedding_dim)]
    params = {}
    for i, (fan_in, fan_out) in enumerate(dims, start=1):
        bound = 1.0 / jnp.sqrt(fan_in)
        # stored as (in, out) == W.T relative to PyTorch's (out, in)
        params[f"w{i}"] = jax.random.uniform(
            keys[2 * (i - 1)], (fan_in, fan_out), jnp.float32, -bound, bound)
        params[f"b{i}"] = jax.random.uniform(
            keys[2 * (i - 1) + 1], (1, fan_out), jnp.float32, -bound, bound)
    return params


def reference_forward(x, params):
    h = jnp.maximum(x @ params["w1"] + params["b1"], 0.0)
    h = jnp.maximum(h @ params["w2"] + params["b2"], 0.0)
    return h @ params["w3"] + params["b3"]


if __name__ == "__main__":
    key = jax.random.PRNGKey(0)
    k_x, k_p, k_big, k_rag = jax.random.split(key, 4)

    input_dim, embedding_dim = 32, 64
    params = init_params(k_p, input_dim, embedding_dim)
    prep_f32 = prepare_params(params, use_bf16=False)   # exact path
    prep_bf16 = prepare_params(params)                   # default: bf16 MXU feed

    # --- small batch, f32, Pallas path forced (single tile) — tight check ---
    x = jax.random.normal(k_x, (8, input_dim), jnp.float32)
    out = jax.block_until_ready(
        memory_embedding_forward(x, prep_f32, min_pallas_batch=0))
    ref = reference_forward(x, params)
    assert out.shape == (8, embedding_dim), out.shape
    assert jnp.allclose(out, ref, atol=1e-5, rtol=1e-5), "f32 small-batch mismatch"

    # --- small batch via the fused-XLA fallback (default min_pallas_batch) ---
    out_fb = jax.block_until_ready(memory_embedding_forward(x, prep_f32))
    assert jnp.allclose(out_fb, ref, atol=1e-5, rtol=1e-5), "XLA fallback mismatch"

    # --- larger batch, bf16 MXU feed (default): 2 grid steps at TB=2048 ---
    xb = jax.random.normal(k_big, (4096, input_dim), jnp.float32)
    out_b = jax.block_until_ready(memory_embedding_forward(xb, prep_bf16))
    ref_b = reference_forward(xb, params)
    assert out_b.shape == (4096, embedding_dim)
    assert jnp.allclose(out_b, ref_b, atol=1e-1, rtol=1e-1), "bf16 batched mismatch"

    # --- ragged batch (2056 = 2048 + 8): no wrapper pad, masked tail tile ---
    xr = jax.random.normal(k_rag, (2056, input_dim), jnp.float32)
    out_r = jax.block_until_ready(memory_embedding_forward(xr, prep_bf16))
    ref_r = reference_forward(xr, params)
    assert out_r.shape == (2056, embedding_dim)
    assert jnp.allclose(out_r, ref_r, atol=1e-1, rtol=1e-1), "ragged batch mismatch"

    print("KERNEL_OK")
</pallas_src>

<mosaic_0001>
module attributes {stable_mosaic.version = 11 : i64} {
  func.func @_mlp_kernel(%arg0: i32, %arg1: memref<8x32xf32, #tpu.memory_space<vmem>>, %arg2: memref<32x64xf32, #tpu.memory_space<vmem>>, %arg3: memref<1x64xf32, #tpu.memory_space<vmem>>, %arg4: memref<64x64xf32, #tpu.memory_space<vmem>>, %arg5: memref<1x64xf32, #tpu.memory_space<vmem>>, %arg6: memref<64x64xf32, #tpu.memory_space<vmem>>, %arg7: memref<1x64xf32, #tpu.memory_space<vmem>>, %arg8: memref<8x64xf32, #tpu.memory_space<vmem>>) attributes {dimension_semantics = [#tpu.dimension_semantics<parallel>], iteration_bounds = array<i64: 1>, scalar_prefetch = 0 : i64, scratch_operands = 0 : i64, tpu.core_type = #tpu.core_type<tc>, window_params = [{transform_indices = @transform_0, window_bounds = array<i64: 8, 32>}, {pipeline_mode = #tpu.pipeline_mode<synchronous>, transform_indices = @transform_1, window_bounds = array<i64: 32, 64>}, {pipeline_mode = #tpu.pipeline_mode<synchronous>, transform_indices = @transform_2, window_bounds = array<i64: 1, 64>}, {pipeline_mode = #tpu.pipeline_mode<synchronous>, transform_indices = @transform_3, window_bounds = array<i64: 64, 64>}, {pipeline_mode = #tpu.pipeline_mode<synchronous>, transform_indices = @transform_4, window_bounds = array<i64: 1, 64>}, {pipeline_mode = #tpu.pipeline_mode<synchronous>, transform_indices = @transform_5, window_bounds = array<i64: 64, 64>}, {pipeline_mode = #tpu.pipeline_mode<synchronous>, transform_indices = @transform_6, window_bounds = array<i64: 1, 64>}, {transform_indices = @transform_7, window_bounds = array<i64: 8, 64>}]} {
    %c0 = arith.constant 0 : index
    %c0_0 = arith.constant 0 : index
    %0 = vector.load %arg1[%c0, %c0_0] : memref<8x32xf32, #tpu.memory_space<vmem>>, vector<8x32xf32>
    %c0_1 = arith.constant 0 : index
    %c0_2 = arith.constant 0 : index
    %1 = vector.load %arg2[%c0_1, %c0_2] : memref<32x64xf32, #tpu.memory_space<vmem>>, vector<32x64xf32>
    %cst = arith.constant dense<0.000000e+00> : vector<8x64xf32>
    %2 = tpu.matmul %0, %1, %cst {dimension_numbers = #tpu.dot_dimension_numbers<[1], [0], [0], [1], [0, 0, 1, 1], [], []>} : vector<8x32xf32>, vector<32x64xf32>, vector<8x64xf32> -> vector<8x64xf32>
    %c0_3 = arith.constant 0 : index
    %c0_4 = arith.constant 0 : index
    %3 = vector.load %arg3[%c0_3, %c0_4] : memref<1x64xf32, #tpu.memory_space<vmem>>, vector<1x64xf32>
    %4 = vector.broadcast %3 : vector<1x64xf32> to vector<8x64xf32>
    %5 = arith.addf %2, %4 : vector<8x64xf32>
    %cst_5 = arith.constant 0.000000e+00 : f32
    %6 = vector.broadcast %cst_5 : f32 to vector<8x64xf32>
    %7 = arith.maximumf %5, %6 : vector<8x64xf32>
    %c0_6 = arith.constant 0 : index
    %c0_7 = arith.constant 0 : index
    %8 = vector.load %arg4[%c0_6, %c0_7] : memref<64x64xf32, #tpu.memory_space<vmem>>, vector<64x64xf32>
    %cst_8 = arith.constant dense<0.000000e+00> : vector<8x64xf32>
    %9 = tpu.matmul %7, %8, %cst_8 {dimension_numbers = #tpu.dot_dimension_numbers<[1], [0], [0], [1], [0, 0, 1, 1], [], []>} : vector<8x64xf32>, vector<64x64xf32>, vector<8x64xf32> -> vector<8x64xf32>
    %c0_9 = arith.constant 0 : index
    %c0_10 = arith.constant 0 : index
    %10 = vector.load %arg5[%c0_9, %c0_10] : memref<1x64xf32, #tpu.memory_space<vmem>>, vector<1x64xf32>
    %11 = vector.broadcast %10 : vector<1x64xf32> to vector<8x64xf32>
    %12 = arith.addf %9, %11 : vector<8x64xf32>
    %cst_11 = arith.constant 0.000000e+00 : f32
    %13 = vector.broadcast %cst_11 : f32 to vector<8x64xf32>
    %14 = arith.maximumf %12, %13 : vector<8x64xf32>
    %c0_12 = arith.constant 0 : index
    %c0_13 = arith.constant 0 : index
    %15 = vector.load %arg6[%c0_12, %c0_13] : memref<64x64xf32, #tpu.memory_space<vmem>>, vector<64x64xf32>
    %cst_14 = arith.constant dense<0.000000e+00> : vector<8x64xf32>
    %16 = tpu.matmul %14, %15, %cst_14 {dimension_numbers = #tpu.dot_dimension_numbers<[1], [0], [0], [1], [0, 0, 1, 1], [], []>} : vector<8x64xf32>, vector<64x64xf32>, vector<8x64xf32> -> vector<8x64xf32>
    %c0_15 = arith.constant 0 : index
    %c0_16 = arith.constant 0 : index
    %17 = vector.load %arg7[%c0_15, %c0_16] : memref<1x64xf32, #tpu.memory_space<vmem>>, vector<1x64xf32>
    %18 = vector.broadcast %17 : vector<1x64xf32> to vector<8x64xf32>
    %19 = arith.addf %16, %18 : vector<8x64xf32>
    %c0_17 = arith.constant 0 : index
    %c0_18 = arith.constant 0 : index
    %20 = vector.load %arg8[%c0_17, %c0_18] : memref<8x64xf32, #tpu.memory_space<vmem>>, vector<8x64xf32>
    tpu.vector_store %arg8[%c0_17, %c0_18], %19 {strides = array<i32>} : memref<8x64xf32, #tpu.memory_space<vmem>>, vector<8x64xf32>,
    return
  }
  func.func @transform_0(%arg0: i32) -> (i32, i32) {
    %c0_i32 = arith.constant 0 : i32
    %c0_i32_0 = arith.constant 0 : i32
    return %arg0, %c0_i32 : i32, i32
  }
  func.func @transform_1(%arg0: i32) -> (i32, i32) {
    %c0_i32 = arith.constant 0 : i32
    %c0_i32_0 = arith.constant 0 : i32
    %c0_i32_1 = arith.constant 0 : i32
    return %c0_i32, %c0_i32_0 : i32, i32
  }
  func.func @transform_2(%arg0: i32) -> (i32, i32) {
    %c0_i32 = arith.constant 0 : i32
    %c0_i32_0 = arith.constant 0 : i32
    %c0_i32_1 = arith.constant 0 : i32
    return %c0_i32, %c0_i32_0 : i32, i32
  }
  func.func @transform_3(%arg0: i32) -> (i32, i32) {
    %c0_i32 = arith.constant 0 : i32
    %c0_i32_0 = arith.constant 0 : i32
    %c0_i32_1 = arith.constant 0 : i32
    return %c0_i32, %c0_i32_0 : i32, i32
  }
  func.func @transform_4(%arg0: i32) -> (i32, i32) {
    %c0_i32 = arith.constant 0 : i32
    %c0_i32_0 = arith.constant 0 : i32
    %c0_i32_1 = arith.constant 0 : i32
    return %c0_i32, %c0_i32_0 : i32, i32
  }
  func.func @transform_5(%arg0: i32) -> (i32, i32) {
    %c0_i32 = arith.constant 0 : i32
    %c0_i32_0 = arith.constant 0 : i32
    %c0_i32_1 = arith.constant 0 : i32
    return %c0_i32, %c0_i32_0 : i32, i32
  }
  func.func @transform_6(%arg0: i32) -> (i32, i32) {
    %c0_i32 = arith.constant 0 : i32
    %c0_i32_0 = arith.constant 0 : i32
    %c0_i32_1 = arith.constant 0 : i32
    return %c0_i32, %c0_i32_0 : i32, i32
  }
  func.func @transform_7(%arg0: i32) -> (i32, i32) {
    %c0_i32 = arith.constant 0 : i32
    %c0_i32_0 = arith.constant 0 : i32
    return %arg0, %c0_i32 : i32, i32
  }
}

</mosaic_0001>

<bundles_post_ra>
// kernel: tpu_custom_call.1
= control target key start
LH: loop header
LB: loop body
LE: loop exit
PB: predicated region body
PF: predicated region fallthrough
CT: control target
= control target key end

     0   :  { %12 = vsyncpa [#allocation3], 0  ;;  %s429_s0 = inlined_call_operand.hbm [shape: f32[8,32], index: 0, kind: input, shape index: {}]   ;;  %s430_s1 = inlined_call_operand.hbm [shape: f32[32,64], index: 1, kind: input, shape index: {}]   ;;  %s431_s2 = inlined_call_operand.vmem [shape: f32[1,64], index: 2, kind: input, shape index: {}]   ;;  %s432_s3 = inlined_call_operand.hbm [shape: f32[64,64], index: 3, kind: input, shape index: {}]   ;;  %s433_s4 = inlined_call_operand.vmem [shape: f32[1,64], index: 4, kind: input, shape index: {}]   ;;  %s434_s5 = inlined_call_operand.hbm [shape: f32[64,64], index: 5, kind: input, shape index: {}]   ;;  %s435_s6 = inlined_call_operand.vmem [shape: f32[1,64], index: 6, kind: input, shape index: {}]   ;;  %s436_s7 = inlined_call_operand.hbm [shape: f32[8,64], index: 7, kind: output, shape index: {}]  }
   0x1   :  { %13 = vsyncpa [#allocation6], 0 }
   0x2   :  { %14 = vsyncpa [#allocation9], 0  ;;  %s31_s26 = sshll.u32 %s430_s1, 4  ;;  %s32_s26 = int_to_ptr.hbm [resolvable:$true] %s31_s26 }
   0x3   :  { %15 = vsyncpa [#allocation4], 0  ;;  %s355_s27 = smov [#allocation5]   ;;  %s21_s8 = sshll.u32 %s429_s0, 4  ;;  %s22_s8 = int_to_ptr.hbm [resolvable:$true] %s21_s8 }
   0x4   :  { %s33_s28 = sshll.u32 %s355_s27, 4  ;;  %s356_s9 = smov 128   ;;  %s34_s28 = int_to_ptr.vmem [resolvable:$true] %s33_s28 }
   0x5   :  { %s357_s10 = smov 8   ;;  %s358_s11 = smov [#allocation2]  }
   0x6   :  { %39 = dma.hbm_to_vmem [thread:$0]  %s32_s26, 512, %s34_s28, [#allocation6], %s356_s9, %s356_s9, %s357_s10  }
   0x7   :  { %s23_s12 = sshll.u32 %s358_s11, 4  ;;  %s46_s15 = sshll.u32 %s432_s3, 4  ;;  %s24_s12 = int_to_ptr.vmem [resolvable:$true] %s23_s12  ;;  %s47_s15 = int_to_ptr.hbm [resolvable:$true] %s46_s15 }
   0x8   :  { %26 = dma.hbm_to_vmem [thread:$0]  %s22_s8, 128, %s24_s12, [#allocation3]  }
   0x9   :  { %s61_s17 = sshll.u32 %s434_s5, 4  ;;  %s359_s18 = smov [#allocation7]   ;;  %s62_s17 = int_to_ptr.hbm [resolvable:$true] %s61_s17 }
   0xa   :  { %s48_s19 = sshll.u32 %s359_s18, 4  ;;  %s360_s0 = smov [#allocation8]   ;;  %s49_s19 = int_to_ptr.vmem [resolvable:$true] %s48_s19 }
   0xb   :  { %54 = dma.hbm_to_vmem [thread:$0]  %s47_s15, 1024, %s49_s19, [#allocation6], %s356_s9, %s356_s9, %s357_s10  }
   0xc   :  { %s63_s20 = sshll.u32 %s360_s0, 4  ;;  %s64_s20 = int_to_ptr.vmem [resolvable:$true] %s63_s20 }
   0xd   :  { %69 = dma.hbm_to_vmem [thread:$0]  %s62_s17, 1024, %s64_s20, [#allocation9], %s356_s9, %s356_s9, %s357_s10  }
   0xe   :  { %347 = dma.done.wait [#allocation3], 128  }
   0xf   :  { %348 = vsyncadd [#allocation3], 4294967168 }
  0x10   :  { %349 = dma.done.wait [#allocation6], 1536  }
  0x11   :  { %350 = vsyncadd [#allocation6], 4294965760 }
  0x12   :  { %351 = dma.done.wait [#allocation9], 1024  }
  0x13   :  { %352 = vsyncadd [#allocation9], 4294966272  ;;  %v92_v0 = vld [vmem:[#allocation5 + $0x18] sm:$0xff]  ;;  %v91_v1 = vld [vmem:[#allocation5 + $0x10] sm:$0xff]  ;;  %vm97_vm0 = vcmask 261120   ;;  %vm134_vm1 = vcmask 523264  }
  0x14   :  { %113 = vmatpush.msra.mxu0 %v92_v0  ;;  %v129_v2 = vld [vmem:[#allocation7 + $0x38] sm:$0xff]  ;;  %v90_v3 = vld [vmem:[#allocation5 + $0x8] sm:$0xff]  ;;  %v128_v4 = vld [vmem:[#allocation7 + $0x30] sm:$0xff]  ;;  %s361_s24 = smov [#allocation10]   ;;  %s202_s28 = sshll.u32 %s436_s7, 4  ;;  %s203_s28 = int_to_ptr.hbm [resolvable:$true] %s202_s28 }
  0x15   :  { %146 = vmatpush.msra.mxu1 %v129_v2  ;;  %v127_v5 = vld [vmem:[#allocation7 + $0x28] sm:$0xff]  ;;  %v89_v6 = vld [vmem:[#allocation5] sm:$0xff]  ;;  %v88_v7 = vld [vmem:[#allocation2] sm:$0xff]  ;;  %s200_s25 = sshll.u32 %s361_s24, 4  ;;  %s201_s25 = int_to_ptr.vmem [resolvable:$true] %s200_s25 }
  0x16   :  { %114 = vmatpush.msra.mxu0 %v91_v1  ;;  %v126_v8 = vld [vmem:[#allocation7 + $0x20] sm:$0xff]  ;;  %v125_v9 = vld [vmem:[#allocation7 + $0x18] sm:$0xff]  ;;  %v124_v10 = vld [vmem:[#allocation7 + $0x10] sm:$0xff] }
  0x17   :  { %147 = vmatpush.msra.mxu1 %v128_v4  ;;  %v123_v11 = vld [vmem:[#allocation7 + $0x8] sm:$0xff]  ;;  %v122_v12 = vld [vmem:[#allocation7] sm:$0xff]  ;;  %v166_v13 = vld [vmem:[#allocation8 + $0x38] sm:$0xff] }
  0x18   :  { %115 = vmatpush.msra.mxu0 %v90_v3  ;;  %v165_v14 = vld [vmem:[#allocation8 + $0x30] sm:$0xff]  ;;  %182 = vmatpush.msra.mxu2 %v166_v13  ;;  %v164_v15 = vld [vmem:[#allocation8 + $0x28] sm:$0xff]  ;;  %v163_v16 = vld [vmem:[#allocation8 + $0x20] sm:$0xff] }
  0x19   :  { %148 = vmatpush.msra.mxu1 %v127_v5  ;;  %v162_v17 = vld [vmem:[#allocation8 + $0x18] sm:$0xff]  ;;  %v161_v22 = vld [vmem:[#allocation8 + $0x10] sm:$0xff]  ;;  %v160_v23 = vld [vmem:[#allocation8 + $0x8] sm:$0xff] }
  0x1a   :  { %116 = vmatpush.msra.mxu0 %v89_v6  ;;  %183 = vmatpush.msra.mxu2 %v165_v14  ;;  %v224_v18 = vld [vmem:[%s431_s2] ss:$0 sm:$0xff]  ;;  %v159_v24 = vld [vmem:[#allocation8] sm:$0xff] }
  0x1b   :  { %214 = vmatmul.msk.f32.vlgmr.msra.gmra.mxu0 %vm97_vm0, %v88_v7  ;;  %149 = vmatpush.msra.mxu1 %v126_v8  ;;  %v225_v25 = vld [vmem:[%s433_s4] ss:$0 sm:$0xff] }
  0x1c   :  { %184 = vmatpush.msra.mxu2 %v164_v15  ;;  %v226_v29 = vld [vmem:[%s435_s6] ss:$0 sm:$0xff] }
  0x1d   :  { %150 = vmatpush.msra.mxu1 %v125_v9 }
  0x1e   :  { %185 = vmatpush.msra.mxu2 %v163_v16 }
  0x1f   :  { %151 = vmatpush.msra.mxu1 %v124_v10 }
  0x20   :  { %186 = vmatpush.msra.mxu2 %v162_v17 }
  0x21   :  { %152 = vmatpush.msra.mxu1 %v123_v11 }
  0x22   :  { %187 = vmatpush.msra.mxu2 %v161_v22 }
  0x23   :  { %153 = vmatpush.msra.mxu1 %v122_v12 }
  0x24   :  { %188 = vmatpush.msra.mxu2 %v160_v23 }
  0x26   :  { %189 = vmatpush.msra.mxu2 %v159_v24 }
  0x98   :  { %v118_v19 = vpop.f32.mrf.mxu0 }
  0x99   :  { %v119_v20 = vadd.f32 %v224_v18, %v118_v19 }
  0x9b   :  { %v121_v21 = vmax.f32 %v119_v20, 0.0 }
  0x9d   :  { %215 = vmatmul.msk.f32.vlgmr.msra.gmra.mxu1 %vm134_vm1, %v121_v21 }
 0x11a   :  { %v155_v26 = vpop.f32.mrf.mxu1 }
 0x11b   :  { %v156_v27 = vadd.f32 %v225_v25, %v155_v26 }
 0x11d   :  { %v158_v28 = vmax.f32 %v156_v27, 0.0 }
 0x11f   :  { %216 = vmatmul.msk.f32.vlgmr.msra.gmra.mxu2 %vm134_vm1, %v158_v28 }
 0x1a2   :  { %v191_v30 = vpop.f32.mrf.mxu2 }
 0x1a3   :  { %v192_v31 = vadd.f32 %v226_v29, %v191_v30 }
 0x1a5   :  { %194 = vst.msk [vmem:[#allocation10] sm:$0xff] %vm134_vm1, %v192_v31 }
 0x1a6   :  { %205 = dma.vmem_to_hbm [thread:$0]  %s201_s25, 128, %s203_s28, [#allocation4]  }
 0x1a7   :  { %353 = dma.done.wait [#allocation4], 128  }
 0x1a8   :  { %354 = vsyncadd [#allocation4], 4294967168 }
 0x1a9   :  { %210 = vsyncpa [#allocation3], 1 }
 0x1aa   :  { %211 = vsyncpa [#allocation6], 1 }
 0x1ab   :  { %212 = vsyncpa [#allocation9], 1 }
 0x1ac   :  { %213 = vsyncpa [#allocation4], 1 }

</bundles_post_ra>
